<compile_context>
chip_gen: v7x
topology: tpu7x:2x2x1
jax: 0.10.0
libtpu: 0.0.40
codegen_flags: <defaults>
</compile_context>

<pallas_src>
import jax
import jax.numpy as jnp
from jax import lax
from jax.experimental import pallas as pl
from jax.experimental.pallas import tpu as pltpu


def edgeconv_kernel(ft_ref, w1_ref, b1_ref, w2r_ref, out_ref,
                    m_ref, l_ref, acc_ref):
    k = pl.program_id(1)

    @pl.when(k == 0)
    def _init():
        m_ref[...] = jnp.full_like(m_ref, -jnp.inf)
        l_ref[...] = jnp.zeros_like(l_ref)
        acc_ref[...] = jnp.zeros_like(acc_ref)

    ft = ft_ref[...]                                          # (block_e, D)

    # Linear1 + ReLU on the MXU, f32 accumulation.
    h = jnp.dot(ft, w1_ref[...], preferred_element_type=jnp.float32)
    h = jnp.maximum(h + b1_ref[...], 0.0)                     # (block_e, Hp)

    # Linear2 (output width 1): VPU multiply + lane reduce — an N=1 MXU matmul
    # would waste 255/256 output columns and emit masked stores.
    # b2 is omitted: it is constant over edges and cancels in the softmax.
    s = jnp.sum(h * w2r_ref[...], axis=-1, keepdims=True)     # (block_e, 1)

    # Online softmax over the edge axis, streamed across edge tiles.
    m_prev = m_ref[...]                                       # (1, 1)
    m_new = jnp.maximum(m_prev, jnp.max(s, axis=0, keepdims=True))
    alpha = jnp.exp(m_prev - m_new)                           # (1, 1)
    p = jnp.exp(s - m_new)                                    # (block_e, 1)
    l_ref[...] = alpha * l_ref[...] + jnp.sum(p, axis=0, keepdims=True)

    # Weighted feature sum through the MXU: p^T @ ft -> (1, D).
    contrib = lax.dot_general(
        p.astype(ft.dtype), ft,
        dimension_numbers=(((0,), (0,)), ((), ())),
        preferred_element_type=jnp.float32)
    acc_ref[...] = alpha * acc_ref[...] + contrib
    m_ref[...] = m_new

    @pl.when(k == pl.num_programs(1) - 1)
    def _finalize():
        inv_l = pl.reciprocal(l_ref[...], approx=True)        # EUP slot
        out_ref[...] = (acc_ref[...] * inv_l).astype(out_ref.dtype)


def edge_conv(ft, w1, b1, w2, b2=None, *, block_e=None):
    """ft: (B,E,D); w1: (D,H); b1: (1,H); w2: (H,1); b2: (1,1) (cancels)."""
    del b2  # softmax(s + b2) == softmax(s): exact to drop.
    B, E, D = ft.shape
    Dw, H = w1.shape
    assert Dw == D

    # Pad hidden dim to a lane-dense multiple of 128 on the host once.
    # Zero-padded columns are exact no-ops: ReLU(x@0 + 0) * 0 == 0.
    Hp = ((H + 127) // 128) * 128
    if Hp != H:
        w1 = jnp.pad(w1, ((0, 0), (0, Hp - H)))
        b1 = jnp.pad(b1, ((0, 0), (0, Hp - H)))
        w2 = jnp.pad(w2, ((0, Hp - H), (0, 0)))
    w1 = w1.astype(ft.dtype)
    b1 = b1.reshape(1, Hp).astype(jnp.float32)
    w2_row = w2.reshape(1, Hp).astype(jnp.float32)   # VPU broadcast operand

    if block_e is None:
        block_e = min(E, 512)                        # ~halve on v7x if D huge
    block_e = min(block_e, E)
    assert E % block_e == 0, "n_edges must be divisible by block_e"
    assert block_e == E or block_e % 8 == 0, "edge tile must be sublane-aligned"
    grid = (B, E // block_e)

    itemsize = jnp.dtype(ft.dtype).itemsize
    cost = pl.CostEstimate(
        flops=int(2 * B * E * D * Hp + 3 * B * E * Hp + 2 * B * E * D),
        transcendentals=int(B * E + B * grid[1]),
        bytes_accessed=int(ft.size * itemsize + (D + 2) * Hp * 4
                           + B * D * itemsize),
    )

    out3 = pl.pallas_call(
        edgeconv_kernel,
        out_shape=jax.ShapeDtypeStruct((B, 1, D), ft.dtype),
        grid_spec=pltpu.PrefetchScalarGridSpec(
            num_scalar_prefetch=0,
            grid=grid,
            in_specs=[
                # ft: batch dim squeezed -> kernel sees (block_e, D) directly,
                # no in-kernel reshape; edge tiles stream along grid axis 1.
                pl.BlockSpec((pl.Squeezed(), block_e, D),
                             lambda b, k: (b, k, 0)),
                # Weights: constant index maps -> fetched once, stay resident.
                pl.BlockSpec((D, Hp), lambda b, k: (0, 0)),
                pl.BlockSpec((1, Hp), lambda b, k: (0, 0)),
                pl.BlockSpec((1, Hp), lambda b, k: (0, 0)),
            ],
            out_specs=pl.BlockSpec((pl.Squeezed(), 1, D),
                                   lambda b, k: (b, 0, 0)),
            scratch_shapes=[
                pltpu.VMEM((1, 1), jnp.float32),   # running max m
                pltpu.VMEM((1, 1), jnp.float32),   # running softmax denom l
                pltpu.VMEM((1, D), jnp.float32),   # running weighted sum
            ],
        ),
        compiler_params=pltpu.CompilerParams(
            # batch is parallel (uses both TCs on v7x); edge axis is a
            # reduction -> arbitrary.
            dimension_semantics=("parallel", "arbitrary"),
            # Raise v5e/v6e scoped defaults while keeping headroom under
            # v7x's 64 MiB physical VMEM.
            vmem_limit_bytes=48 * 1024 * 1024,
        ),
        cost_estimate=cost,
    )(ft, w1, b1, w2_row)
    return jnp.squeeze(out3, axis=1)


def edge_conv_ref(ft, w1, b1, w2, b2):
    # Pure-JAX reference for sanity check.
    h = jnp.maximum(jnp.einsum("bed,dh->beh", ft, w1) + b1[0], 0.0)
    s = jnp.einsum("beh,ho->beo", h, w2) + b2[0]          # (B, E, 1)
    p = jax.nn.softmax(s, axis=1)
    return jnp.sum(p * ft, axis=1)


if __name__ == "__main__":
    B, E, D, H = 2, 16, 16, 32   # batch, n_edges, dim_ft, hidden

    key = jax.random.PRNGKey(0)
    k_ft, k_w1, k_b1, k_w2, k_b2 = jax.random.split(key, 5)

    ft = jax.random.normal(k_ft, (B, E, D), dtype=jnp.float32)
    # nn.Linear(dim_ft, hidden), nn.Linear(hidden, 1); stored transposed for
    # the x @ W + b convention (W = torch_weight.T).
    w1 = jax.random.normal(k_w1, (D, H), dtype=jnp.float32) * 0.1
    b1 = jax.random.normal(k_b1, (1, H), dtype=jnp.float32) * 0.1
    w2 = jax.random.normal(k_w2, (H, 1), dtype=jnp.float32) * 0.1
    b2 = jax.random.normal(k_b2, (1, 1), dtype=jnp.float32) * 0.1

    # block_e=8 -> 2 edge tiles, exercising the online-softmax accumulator.
    out = edge_conv(ft, w1, b1, w2, b2, block_e=8)
    out = jax.block_until_ready(out)

    ref = edge_conv_ref(ft, w1, b1, w2, b2)
    assert out.shape == (B, D), out.shape
    err = float(jnp.max(jnp.abs(out - ref)))
    # approx reciprocal in the softmax normalization -> loosened tolerance.
    assert jnp.allclose(out, ref, atol=2e-3, rtol=2e-3), err

    print("KERNEL_OK")
</pallas_src>

<mosaic_0001>
module attributes {stable_mosaic.version = 11 : i64} {
  func.func @edgeconv_kernel(%arg0: i32, %arg1: i32, %arg2: memref<1x8x16xf32, #tpu.memory_space<vmem>>, %arg3: memref<16x128xf32, #tpu.memory_space<vmem>>, %arg4: memref<1x128xf32, #tpu.memory_space<vmem>>, %arg5: memref<1x128xf32, #tpu.memory_space<vmem>>, %arg6: memref<1x1x16xf32, #tpu.memory_space<vmem>>, %arg7: memref<1x1xf32, #tpu.memory_space<vmem>>, %arg8: memref<1x1xf32, #tpu.memory_space<vmem>>, %arg9: memref<1x16xf32, #tpu.memory_space<vmem>>) attributes {dimension_semantics = [#tpu.dimension_semantics<parallel>, #tpu.dimension_semantics<arbitrary>], iteration_bounds = array<i64: 2, 2>, scalar_prefetch = 0 : i64, scratch_operands = 3 : i64, tpu.core_type = #tpu.core_type<tc>, window_params = [{transform_indices = @transform_0, window_bounds = array<i64: 1, 8, 16>}, {pipeline_mode = #tpu.pipeline_mode<synchronous>, transform_indices = @transform_1, window_bounds = array<i64: 16, 128>}, {pipeline_mode = #tpu.pipeline_mode<synchronous>, transform_indices = @transform_2, window_bounds = array<i64: 1, 128>}, {pipeline_mode = #tpu.pipeline_mode<synchronous>, transform_indices = @transform_3, window_bounds = array<i64: 1, 128>}, {transform_indices = @transform_4, window_bounds = array<i64: 1, 1, 16>}]} {
    %c0_i32 = arith.constant 0 : i32
    %0 = arith.cmpi eq, %arg1, %c0_i32 : i32
    %1 = arith.extui %0 : i1 to i32
    %c0_i32_0 = arith.constant 0 : i32
    %2 = arith.cmpi ne, %1, %c0_i32_0 : i32
    scf.if %2 {
      %cst_27 = arith.constant 0xFF800000 : f32
      %42 = vector.broadcast %cst_27 : f32 to vector<1x1xf32>
      %c0_28 = arith.constant 0 : index
      %c0_29 = arith.constant 0 : index
      %43 = vector.load %arg7[%c0_28, %c0_29] : memref<1x1xf32, #tpu.memory_space<vmem>>, vector<1x1xf32>
      tpu.vector_store %arg7[%c0_28, %c0_29], %42 {strides = array<i32>} : memref<1x1xf32, #tpu.memory_space<vmem>>, vector<1x1xf32>,
      %cst_30 = arith.constant 0.000000e+00 : f32
      %44 = vector.broadcast %cst_30 : f32 to vector<1x1xf32>
      %c0_31 = arith.constant 0 : index
      %c0_32 = arith.constant 0 : index
      %45 = vector.load %arg8[%c0_31, %c0_32] : memref<1x1xf32, #tpu.memory_space<vmem>>, vector<1x1xf32>
      tpu.vector_store %arg8[%c0_31, %c0_32], %44 {strides = array<i32>} : memref<1x1xf32, #tpu.memory_space<vmem>>, vector<1x1xf32>,
      %cst_33 = arith.constant 0.000000e+00 : f32
      %46 = vector.broadcast %cst_33 : f32 to vector<1x16xf32>
      %c0_34 = arith.constant 0 : index
      %c0_35 = arith.constant 0 : index
      %47 = vector.load %arg9[%c0_34, %c0_35] : memref<1x16xf32, #tpu.memory_space<vmem>>, vector<1x16xf32>
      tpu.vector_store %arg9[%c0_34, %c0_35], %46 {strides = array<i32>} : memref<1x16xf32, #tpu.memory_space<vmem>>, vector<1x16xf32>,
    } else {
    }
    %c0 = arith.constant 0 : index
    %c0_1 = arith.constant 0 : index
    %c0_2 = arith.constant 0 : index
    %3 = vector.load %arg2[%c0, %c0_1, %c0_2] : memref<1x8x16xf32, #tpu.memory_space<vmem>>, vector<1x8x16xf32>
    %4 = vector.shape_cast %3 : vector<1x8x16xf32> to vector<8x16xf32>
    %c0_3 = arith.constant 0 : index
    %c0_4 = arith.constant 0 : index
    %5 = vector.load %arg3[%c0_3, %c0_4] : memref<16x128xf32, #tpu.memory_space<vmem>>, vector<16x128xf32>
    %cst = arith.constant dense<0.000000e+00> : vector<8x128xf32>
    %6 = tpu.matmul %4, %5, %cst {dimension_numbers = #tpu.dot_dimension_numbers<[1], [0], [0], [1], [0, 0, 1, 1], [], []>} : vector<8x16xf32>, vector<16x128xf32>, vector<8x128xf32> -> vector<8x128xf32>
    %c0_5 = arith.constant 0 : index
    %c0_6 = arith.constant 0 : index
    %7 = vector.load %arg4[%c0_5, %c0_6] : memref<1x128xf32, #tpu.memory_space<vmem>>, vector<1x128xf32>
    %8 = vector.broadcast %7 : vector<1x128xf32> to vector<8x128xf32>
    %9 = arith.addf %6, %8 : vector<8x128xf32>
    %cst_7 = arith.constant 0.000000e+00 : f32
    %10 = vector.broadcast %cst_7 : f32 to vector<8x128xf32>
    %11 = arith.maximumf %9, %10 : vector<8x128xf32>
    %c0_8 = arith.constant 0 : index
    %c0_9 = arith.constant 0 : index
    %12 = vector.load %arg5[%c0_8, %c0_9] : memref<1x128xf32, #tpu.memory_space<vmem>>, vector<1x128xf32>
    %13 = vector.broadcast %12 : vector<1x128xf32> to vector<8x128xf32>
    %14 = arith.mulf %11, %13 : vector<8x128xf32>
    %cst_10 = arith.constant dense<0.000000e+00> : vector<8xf32>
    %15 = vector.multi_reduction <add>, %14, %cst_10 [1] : vector<8x128xf32> to vector<8xf32>
    %16 = vector.shape_cast %15 : vector<8xf32> to vector<8x1xf32>
    %c0_11 = arith.constant 0 : index
    %c0_12 = arith.constant 0 : index
    %17 = vector.load %arg7[%c0_11, %c0_12] : memref<1x1xf32, #tpu.memory_space<vmem>>, vector<1x1xf32>
    %cst_13 = arith.constant dense<0xFF800000> : vector<1xf32>
    %18 = vector.multi_reduction <maximumf>, %16, %cst_13 [0] : vector<8x1xf32> to vector<1xf32>
    %19 = vector.shape_cast %18 : vector<1xf32> to vector<1x1xf32>
    %20 = arith.maximumf %17, %19 : vector<1x1xf32>
    %21 = arith.subf %17, %20 : vector<1x1xf32>
    %22 = math.exp %21 : vector<1x1xf32>
    %23 = vector.broadcast %20 : vector<1x1xf32> to vector<8x1xf32>
    %24 = arith.subf %16, %23 : vector<8x1xf32>
    %25 = math.exp %24 : vector<8x1xf32>
    %c0_14 = arith.constant 0 : index
    %c0_15 = arith.constant 0 : index
    %26 = vector.load %arg8[%c0_14, %c0_15] : memref<1x1xf32, #tpu.memory_space<vmem>>, vector<1x1xf32>
    %27 = arith.mulf %22, %26 : vector<1x1xf32>
    %cst_16 = arith.constant dense<0.000000e+00> : vector<1xf32>
    %28 = vector.multi_reduction <add>, %25, %cst_16 [0] : vector<8x1xf32> to vector<1xf32>
    %29 = vector.shape_cast %28 : vector<1xf32> to vector<1x1xf32>
    %30 = arith.addf %27, %29 : vector<1x1xf32>
    %c0_17 = arith.constant 0 : index
    %c0_18 = arith.constant 0 : index
    %31 = vector.load %arg8[%c0_17, %c0_18] : memref<1x1xf32, #tpu.memory_space<vmem>>, vector<1x1xf32>
    tpu.vector_store %arg8[%c0_17, %c0_18], %30 {strides = array<i32>} : memref<1x1xf32, #tpu.memory_space<vmem>>, vector<1x1xf32>,
    %cst_19 = arith.constant dense<0.000000e+00> : vector<1x16xf32>
    %32 = tpu.matmul %25, %4, %cst_19 {dimension_numbers = #tpu.dot_dimension_numbers<[0], [0], [1], [1], [0, 1, 1, 1], [], []>} : vector<8x1xf32>, vector<8x16xf32>, vector<1x16xf32> -> vector<1x16xf32>
    %c0_20 = arith.constant 0 : index
    %c0_21 = arith.constant 0 : index
    %33 = vector.load %arg9[%c0_20, %c0_21] : memref<1x16xf32, #tpu.memory_space<vmem>>, vector<1x16xf32>
    %34 = vector.broadcast %22 : vector<1x1xf32> to vector<1x16xf32>
    %35 = arith.mulf %34, %33 : vector<1x16xf32>
    %36 = arith.addf %35, %32 : vector<1x16xf32>
    %c0_22 = arith.constant 0 : index
    %c0_23 = arith.constant 0 : index
    %37 = vector.load %arg9[%c0_22, %c0_23] : memref<1x16xf32, #tpu.memory_space<vmem>>, vector<1x16xf32>
    tpu.vector_store %arg9[%c0_22, %c0_23], %36 {strides = array<i32>} : memref<1x16xf32, #tpu.memory_space<vmem>>, vector<1x16xf32>,
    %c0_24 = arith.constant 0 : index
    %c0_25 = arith.constant 0 : index
    %38 = vector.load %arg7[%c0_24, %c0_25] : memref<1x1xf32, #tpu.memory_space<vmem>>, vector<1x1xf32>
    tpu.vector_store %arg7[%c0_24, %c0_25], %20 {strides = array<i32>} : memref<1x1xf32, #tpu.memory_space<vmem>>, vector<1x1xf32>,
    %c1_i32 = arith.constant 1 : i32
    %39 = arith.cmpi eq, %arg1, %c1_i32 : i32
    %40 = arith.extui %39 : i1 to i32
    %c0_i32_26 = arith.constant 0 : i32
    %41 = arith.cmpi ne, %40, %c0_i32_26 : i32
    scf.if %41 {
      %c0_27 = arith.constant 0 : index
      %c0_28 = arith.constant 0 : index
      %42 = vector.load %arg8[%c0_27, %c0_28] : memref<1x1xf32, #tpu.memory_space<vmem>>, vector<1x1xf32>
      %43 = tpu.reciprocal %42 {approx = true} : vector<1x1xf32> -> vector<1x1xf32>
      %c0_29 = arith.constant 0 : index
      %c0_30 = arith.constant 0 : index
      %44 = vector.load %arg9[%c0_29, %c0_30] : memref<1x16xf32, #tpu.memory_space<vmem>>, vector<1x16xf32>
      %45 = vector.broadcast %43 : vector<1x1xf32> to vector<1x16xf32>
      %46 = arith.mulf %44, %45 : vector<1x16xf32>
      %c0_31 = arith.constant 0 : index
      %c0_32 = arith.constant 0 : index
      %c0_33 = arith.constant 0 : index
      %47 = vector.load %arg6[%c0_31, %c0_32, %c0_33] : memref<1x1x16xf32, #tpu.memory_space<vmem>>, vector<1x1x16xf32>
      %48 = vector.shape_cast %47 : vector<1x1x16xf32> to vector<1x16xf32>
      %49 = vector.shape_cast %46 : vector<1x16xf32> to vector<1x1x16xf32>
      tpu.vector_store %arg6[%c0_31, %c0_32, %c0_33], %49 {strides = array<i32>} : memref<1x1x16xf32, #tpu.memory_space<vmem>>, vector<1x1x16xf32>,
    } else {
    }
    return
  }
  func.func @transform_0(%arg0: i32, %arg1: i32) -> (i32, i32, i32) {
    %c0_i32 = arith.constant 0 : i32
    %c0_i32_0 = arith.constant 0 : i32
    return %arg0, %arg1, %c0_i32 : i32, i32, i32
  }
  func.func @transform_1(%arg0: i32, %arg1: i32) -> (i32, i32) {
    %c0_i32 = arith.constant 0 : i32
    %c0_i32_0 = arith.constant 0 : i32
    %c0_i32_1 = arith.constant 0 : i32
    return %c0_i32, %c0_i32_0 : i32, i32
  }
  func.func @transform_2(%arg0: i32, %arg1: i32) -> (i32, i32) {
    %c0_i32 = arith.constant 0 : i32
    %c0_i32_0 = arith.constant 0 : i32
    %c0_i32_1 = arith.constant 0 : i32
    return %c0_i32, %c0_i32_0 : i32, i32
  }
  func.func @transform_3(%arg0: i32, %arg1: i32) -> (i32, i32) {
    %c0_i32 = arith.constant 0 : i32
    %c0_i32_0 = arith.constant 0 : i32
    %c0_i32_1 = arith.constant 0 : i32
    return %c0_i32, %c0_i32_0 : i32, i32
  }
  func.func @transform_4(%arg0: i32, %arg1: i32) -> (i32, i32, i32) {
    %c0_i32 = arith.constant 0 : i32
    %c0_i32_0 = arith.constant 0 : i32
    %c0_i32_1 = arith.constant 0 : i32
    return %arg0, %c0_i32, %c0_i32_0 : i32, i32, i32
  }
}

</mosaic_0001>

<bundles_post_ra>
// kernel: tpu_custom_call.1
= control target key start
LH: loop header
LB: loop body
LE: loop exit
PB: predicated region body
PF: predicated region fallthrough
CT: control target
= control target key end

     0   :  { %s1285_s0 = inlined_call_operand.hbm [shape: f32[2,16,16], index: 0, kind: input, shape index: {}]   ;;  %s1286_s1 = inlined_call_operand.hbm [shape: f32[16,128], index: 1, kind: input, shape index: {}]   ;;  %s1287_s2 = inlined_call_operand.vmem [shape: f32[1,128], index: 2, kind: input, shape index: {}]   ;;  %s1288_s3 = inlined_call_operand.vmem [shape: f32[1,128], index: 3, kind: input, shape index: {}]   ;;  %s1289_s4 = inlined_call_operand.hbm [shape: f32[2,1,16], index: 4, kind: output, shape index: {}]  }
   0x1   :  { %1301 = sst [smem:[#allocation19_spill]] %s1286_s1 }
   0x2   :  { %1302 = sst [smem:[#allocation20_spill]] %s1287_s2 }
   0x3   :  { %1303 = sst [smem:[#allocation21_spill]] %s1288_s3 }
   0x4   :  { %1304 = sst [smem:[#allocation22_spill]] %s1289_s4 }
   0x5   :  { %9 = vsyncpa [#allocation6], 0 }
   0x6   :  { %11 = vsyncpa [#allocation6 + $0x1], 0 }
   0x7   :  { %12 = vsyncpa [#allocation9], 0 }
   0x8   :  { %13 = vsyncpa [#allocation7], 0 }
   0x9   :  { %15 = vsyncpa [#allocation7 + $0x1], 0  ;;  %s1015_s15 = smov 0   ;;  %s1017_s16 = smov 0  }
   0xa   :  { %s1019_s17 = smov 0   ;;  %s1021_s18 = smov 0  }
   0xb   :  { %s1023_s19 = smov 0   ;;  %s1025_s20 = smov 0  }
   0xc   :  { %s1027_s21 = smov 0   ;;  %s1029_s22 = smov 0  }
   0xd   :  { %s1031_s23 = smov 0   ;;  %s1033_s24 = smov 0  }
   0xe   :  { %s1035_s25 = smov 0  }
   0xf LB: > { %1305 = sst [smem:[#allocation14_spill]] %s936_s15  ;;  %s621_s26 = sadd.s32 4294967295, %s976_s25   ;;  %s976_s25 = sphi %s1035_s25, %s21_s25   ;;  %s972_s24 = sphi %s1033_s24, %s1341_s24   ;;  %s968_s23 = sphi %s1031_s23, %s1340_s23   ;;  %s964_s22 = sphi %s1029_s22, %s1339_s22   ;;  %s960_s21 = sphi %s1027_s21, %s1338_s21   ;;  %s956_s20 = sphi %s1025_s20, %s1337_s20   ;;  %s952_s19 = sphi %s1023_s19, %s1336_s19   ;;  %s948_s18 = sphi %s1021_s18, %s1335_s18   ;;  %s944_s17 = sphi %s1019_s17, %s1334_s17   ;;  %s940_s16 = sphi %s1017_s16, %s1333_s16   ;;  %s936_s15 = sphi %s1015_s15, %s1332_s15  }
  0x10   : > { %1306 = sst [smem:[#allocation15_spill]] %s964_s22  ;;  %s622_s27 = sadd.s32 4294967294, %s976_s25  }
  0x11   : > { %p55_p0 = scmp.ne.s32.totalorder %s952_s19, %s948_s18  ;;  %p1071_p1 = scmp.eq.s32.totalorder %s621_s26, 0 }
  0x12   : > { %p141_p2 = scmp.ne.s32.totalorder %s944_s17, %s940_s16  ;;  %p142_p3 = scmp.eq.s32.totalorder %s621_s26, 3 }
  0x13   : > { %s1307_s28 = scalar_select %p1071_p1, 1, 0 }
  0x14   : > { %p1079_p4 = por %p1071_p1, %p55_p0  ;;  %p147_p5 = scmp.ne.s32.totalorder %s940_s16, %s936_s15 }
  0x15   : > { %p1085_p6 = por %p142_p3, %p141_p2  ;;  %p148_p7 = scmp.eq.s32.totalorder %s622_s27, 3 }
  0x16   : > { %s1308_s29 = scalar_select %p1079_p4, 1, 0 }
  0x17   : > { %s1309_s30 = scalar_select %p1085_p6, 1, 0 }
  0x18   : > { %p623_p8 = scmp.ge.s32.totalorder %s976_s25, 1  ;;  %p155_p9 = scmp.lt.s32.totalorder %s976_s25, 5 }
  0x19   : > { %1310 = sst [smem:[#allocation16_spill]] %s1309_s30  ;;  %p1091_p10 = por %p148_p7, %p147_p5 }
  0x1a   : > { %p1095_p11 = pnand %p623_p8, %p155_p9  ;;  %s978_s7 = smov [#allocation8]  }
  0x1b   : > { %s1311_s5 = scalar_select %p1091_p10, 1, 0 }
  0x1c   : > { %s1313_s6 = scalar_select %p1095_p11, 1, 0 }
  0x1d   : > { %1312 = sst [smem:[#allocation17_spill]] %s1311_s5  ;;  %s167_s8 = sshll.u32 %s978_s7, 4  ;;  %s168_s8 = int_to_ptr.vmem [resolvable:$true] %s167_s8 }
  0x1e   : > { %p669_p12 = pneg %p1095_p11  ;;  %s1315_s1 = sld [smem:[#allocation19_spill]] }
  0x20   : > { %p1103_p13 = pnand %p669_p12, %p1071_p1 }
  0x22   : > { %p794_p2 = pneg %p1103_p13 }
  0x24   : > { %s792_s12 = scalar_lea.hbm %s1315_s1, 256 }
  0x25   : > { %p793_p0 = scmp.ne.s32.totalorder %s1315_s1, %s792_s12  ;;  %p799_p7 = scmp.lt.u32.totalorder %s792_s12, %s1315_s1 }
  0x27   : > { %p795_p3 = pnand %p794_p2, %p793_p0 }
  0x29   : > { %p796_p5 = pneg %p795_p3 }
  0x2b   : > { %p801_p8 = pnand %p799_p7, %p796_p5 }
  0x2d   : > { %804 = shalt.err (!%p801_p8)
}
  0x2e   : > { %s805_s27 = scalar_lea.vmem %s168_s8, 256  ;;  %p813_p6 = scmp.lt.s32.totalorder %s168_s8, %s168_s8 }
  0x2f   : > { %p806_p9 = scmp.ne.s32.totalorder %s168_s8, %s805_s27  ;;  %p814_p1 = scmp.lt.s32.totalorder %s805_s27, %s805_s27 }
  0x31   : > { %p808_p12 = pnand %p806_p9, %p794_p2  ;;  %p815_p4 = por %p814_p1, %p813_p6 }
  0x33   : > { %p809_p10 = pneg %p808_p12 }
  0x35   : > { %p816_p11 = pnand %p815_p4, %p809_p10 }
  0x37   : > { %819 = shalt.err (!%p816_p11)
}
  0x38   : > { %s979_s7 = smov 128   ;;  %s980_s10 = smov 8  }
  0x39   : > { %672 = dma.hbm_to_vmem [thread:$0]  (!%p1103_p13), %s1315_s1, 256, %s168_s8, [#allocation9], %s979_s7, %s979_s7, %s980_s10  }
  0x3a   : > { %s30_s13 = sadd.s32 1, %s968_s23  ;;  %s33_s14 = sadd.s32 1, %s972_s24 }
  0x3b   : > { %p31_p1 = scmp.ge.s32.totalorder %s30_s13, 2  ;;  %s42_s18 = sadd.s32 1, %s956_s20 }
  0x3c   : > { %p49_p4 = scmp.ne.s32.totalorder %s956_s20, %s952_s19  ;;  %p50_p6 = scmp.eq.s32.totalorder %s976_s25, 0 }
  0x3d   : > { %s1343_s13 = smov (%p31_p1, %s30_s13), 0  ;;  %s1345_s14 = smov (!%p31_p1, %s33_s14), %s972_s24 }
  0x3e   : > { %1316 = sst [smem:[#allocation18_spill]] %s1343_s13  ;;  %s38_s9 = ssub.s32 %s968_s23, %s1343_s13 }
  0x3f   : > { %p1134_p10 = por %p50_p6, %p49_p4  ;;  %p35_p11 = scmp.ge.s32.totalorder %s1345_s14, 2 }
  0x40   : > { %s131_s8 = sadd.s32 1, %s944_s17  ;;  %p682_p13 = scmp.lt.s32.totalorder %s976_s25, 4 }
  0x41   : > { %s187_s27 = sand.u32 1, %s956_s20   ;;  %s1347_s14 = smov (%p35_p11, %s1345_s14), 0 }
  0x42   : > { %s626_s7 = sshll.u32 %s187_s27, 3  ;;  %s37_s10 = ssub.s32 %s972_s24, %s1347_s14 }
  0x43   : > { %s39_s11 = sor.u32 %s38_s9, %s37_s10  ;;  %p129_p0 = scmp.eq.s32.totalorder %s37_s10, 0 }
  0x44   : > { %p40_p2 = scmp.eq.s32.totalorder %s39_s11, 0  ;;  %s627_s12 = sshll.u32 %s972_s24, 1 }
  0x45   : > { %s1147_s1 = scalar_select %p129_p0, %s944_s17, %s131_s8  }
  0x46   : > { %s1150_s13 = scalar_select %p40_p2, %s956_s20, %s42_s18  }
  0x47   : > { %s196_s5 = sadd.s32 %s968_s23, %s627_s12  ;;  %s191_s15 = scalar_lea.vmem [#allocation5], %s626_s7 }
  0x48   : > { %s200_s4 = sshll.u32 %s191_s15, 4  ;;  %s628_s30 = sshll.u32 %s196_s5, 7  ;;  %s1153_s4 = int_to_ptr.vmem [resolvable:$true] %s200_s4 }
  0x49   : > { %s1158_s2 = scalar_lea.hbm %s1285_s0, %s628_s30  ;;  %p1164_p3 = pnand %p682_p13, %p1134_p10 }
  0x4a   : > { %s188_s15 = scalar_lea.sflag [#allocation6], %s187_s27  ;;  %s820_s5 = scalar_lea.hbm %s1158_s2, 128 }
  0x4b   : > { %p821_p5 = scmp.ne.s32.totalorder %s1158_s2, %s820_s5  ;;  %p822_p7 = pneg %p1164_p3 }
  0x4c   : > { %s825_s30 = scalar_lea.hbm %s1285_s0, 512  ;;  %p826_p12 = scmp.lt.u32.totalorder %s1158_s2, %s1285_s0 }
  0x4d   : > { %p823_p8 = pnand %p822_p7, %p821_p5  ;;  %p827_p1 = scmp.lt.u32.totalorder %s825_s30, %s820_s5 }
  0x4e   : > { %p829_p6 = scmp.lt.u32.totalorder %s820_s5, %s1158_s2 }
  0x4f   : > { %p824_p9 = pneg %p823_p8  ;;  %p828_p4 = por %p827_p1, %p826_p12 }
  0x51   : > { %p830_p10 = por %p829_p6, %p828_p4 }
  0x53   : > { %p831_p11 = pnand %p830_p10, %p824_p9 }
  0x55   : > { %834 = shalt.err (!%p831_p11)
}
  0x56   : > { %s835_s8 = scalar_lea.vmem %s1153_s4, 128  ;;  %s981_s27 = smov [#allocation5]  }
  0x57   : > { %p836_p13 = scmp.ne.s32.totalorder %s1153_s4, %s835_s8  ;;  %s840_s7 = sshll.u32 %s981_s27, 4  ;;  %s841_s7 = int_to_ptr.vmem [resolvable:$false] %s840_s7 }
  0x58   : > { %s842_s10 = scalar_lea.vmem %s841_s7, 256  ;;  %p843_p5 = scmp.lt.s32.totalorder %s1153_s4, %s841_s7 }
  0x59   : > { %p838_p0 = pnand %p836_p13, %p822_p7  ;;  %p844_p8 = scmp.lt.s32.totalorder %s842_s10, %s835_s8 }
  0x5b   : > { %p839_p2 = pneg %p838_p0  ;;  %p845_p12 = por %p844_p8, %p843_p5 }
  0x5d   : > { %p846_p1 = pnand %p845_p12, %p839_p2 }
  0x5f   : > { %849 = shalt.err (!%p846_p1)
}
  0x60   : > { %676 = dma.hbm_to_vmem [thread:$0]  (!%p1164_p3), %s1158_s2, 128, %s1153_s4, %s188_s15  }
  0x61   : > { %p1319_p9 = scmp.ne.s32.totalorder %s1313_s6, 0 }
  0x62   : > { %s211_s11 = sand.u32 (!%p1319_p9), 1, %s952_s19   ;;  %p1320_p7 = scmp.ne.s32.totalorder (!%p1319_p9), %s1308_s29, 0 }
  0x63   : > { %209 = sbr.rel (%p1319_p9) target bundleno = 897 (0x381), region = 36  ;;  %s630_s12 = sshll.u32 (!%p1319_p9), %s211_s11, 3 }
  0x64   : > { %s212_s5 = scalar_lea.sflag (!%p1319_p9), [#allocation6], %s211_s11  ;;  %s215_s3 = scalar_lea.vmem (!%p1319_p9), [#allocation5], %s630_s12 }
  0x6a   : > { %923 = dma.done.wait (%p1320_p7), %s212_s5, 128  }
  0x6b   : > { %925 = vsyncadd (%p1320_p7), %s212_s5, 4294967168  ;;  %p1321_p4 = scmp.ne.s32.totalorder %s1307_s28, 0 }
  0x6d   : > { %927 = dma.done.wait (%p1321_p4), [#allocation9], 256  }
  0x6e   : > { %929 = vsyncadd (%p1321_p4), [#allocation9], 4294967040  ;;  %s241_s2 = sand.u32 1, %s940_s16   ;;  %p632_p3 = scmp.ne.s32.totalorder %s960_s21, 0 }
  0x6f   : > { %s1207_s4 = scalar_lea.vmem [#allocation10], %s241_s2  ;;  %vm247_vm0 = vcmask (!%p632_p3), 0   ;;  %vm250_vm1 = vcmask (!%p632_p3), 122880   ;;  %v982_v0 = vmov (!%p632_p3), -inf   ;;  %v983_v1 = vmov (!%p632_p3), 0.0  }
  0x70   : > { %246 = sbr.rel (%p632_p3) target bundleno = 119 (0x77), region = 48  ;;  %248 = vst.msk [vmem:[#allocation2] sm:$0x1] (!%p632_p3), %vm247_vm0, %v982_v0  ;;  %249 = vst.msk [vmem:[#allocation3] sm:$0x1] (!%p632_p3), %vm247_vm0, %v983_v1 }
  0x71   : > { %251 = vst.msk [vmem:[#allocation4] sm:$0x1] (!%p632_p3), %vm250_vm1, %v983_v1 }
  0x77 PF: > { %v253_v2 = vld [vmem:[#allocation8] sm:$0xff]  ;;  %v254_v3 = vld [vmem:[#allocation8 + $0x8] sm:$0xff]  ;;  %v984_v4 = vmov 0.0|0.0   ;;  %vm985_vm2 = vmmov 0   ;;  %v986_v6 = vmov 0.0   ;;  %v252_v7 = vld [vmem:[%s215_s3] sm:$0xff]  ;;  %v359_v18 = vlaneseq }
  0x78   : > { %658 = vmatprep.subr.bf16.mxu0 %v984_v4  ;;  %v659_v5 = vpack.c.bf16 %v254_v3, %v253_v2  ;;  %650 = vmatprep.mubr.msk.f32.mxu0 %vm985_vm2, %v986_v6  ;;  %vm262_vm3 = vcmask 130048   ;;  %s1322_s6 = sld [smem:[#allocation20_spill]]  ;;  %s1323_s22 = sld [smem:[#allocation21_spill]]  ;;  %v987_v15 = vmov 0   ;;  %v347_v24 = vld [vmem:[#allocation2] sm:$0x1] }
  0x79   : > { %653 = vmatprep.subr.mxu1 %v986_v6  ;;  %655 = vmatprep.mubr.msk.f32.mxu1 %vm985_vm2, %v986_v6  ;;  %v360_v21 = vshrl.u32 %v359_v18, 7  ;;  %vm378_vm4 = vcmask 0   ;;  %vm369_vm5 = vcmask 7168   ;;  %v367_v40 = vld [vmem:[#allocation3] sm:$0x1]  ;;  %vm412_vm6 = vcmask 64512  }
  0x7a   : > { %660 = vmatpush3.bf16.msra.mxu0 %v659_v5  ;;  %654 = vmatpush3.msra.mxu1 %v252_v7  ;;  %v486_v48 = vld [vmem:[#allocation4] sm:$0x1]  ;;  %vm498_vm7 = vcmask 122880   ;;  %p637_p6 = scmp.ne.s32.totalorder %s960_s21, 1 }
  0x7b   : > { %783 = vset.pattern.permute.xlu1 %v987_v15  ;;  %v361_v25 = vsub.s32 0, %v360_v21  ;;  %v988_v54 = vmov (!%p637_p6), 0  }
  0x7d   : > { %651 = vmatmul.mubr.msk.f32.vlgmr.msra.gmra.mrb[0].mxu0 %vm262_vm3, %v252_v7 }
  0x7e   : > { %v633_v8 = vld [vmem:[%s1322_s6] ss:$0 sm:$0xff] }
  0x7f   : > { %v635_v12 = vld [vmem:[%s1323_s22] ss:$0 sm:$0xff] }
 0x150   : > { %v332_v9 = vpop.f32.mrb[0].mxu0 }
 0x151   : > { %v333_v10 = vadd.f32 %v633_v8, %v332_v9  ;;  %v652_v11 = vpop.f32.mrb[1].mxu0 }
 0x153   : > { %v336_v13 = vmax.f32 %v333_v10, 0.0 }
 0x155   : > { %v344_v14 = vmul.f32 %v635_v12, %v336_v13 }
 0x157   : > { %345 = vadd.xlane.f32.xlu0 %v344_v14 }
 0x1e4   : > { %v346_v16 = vpop.xlane.xlu0 %345 }
 0x1e5   : > { %v348_v17 = vrot.slane %v346_v16, 4 }
 0x1e7   : > { %v349_v19 = vmax.f32 %v346_v16, %v348_v17 }
 0x1e9   : > { %v350_v20 = vrot.slane %v349_v19, 2 }
 0x1eb   : > { %v351_v22 = vmax.f32 %v349_v19, %v350_v20 }
 0x1ed   : > { %v352_v23 = vrot.slane %v351_v22, 1 }
 0x1ef   : > { %v353_v26 = vmax.f32 %v351_v22, %v352_v23 }
 0x1f1   : > { %v354_v27 = vmax.f32 %v347_v24, %v353_v26 }
 0x1f3   : > { %v362_v28 = vrot.slane %v354_v27, %v361_v25  ;;  %500 = vst.msk [vmem:[#allocation2] sm:$0x1] %vm378_vm4, %v354_v27  ;;  %v355_v29 = vsub.f32 %v347_v24, %v354_v27 }
 0x1f5   : > { %v364_v30 = vsub.f32 %v346_v16, %v362_v28  ;;  %v356_v31 = vmul.f32 1.442695, %v355_v29 }
 0x1f7   : > { %v365_v32 = vmul.f32 1.442695, %v364_v30  ;;  %785 = vpow2.f32 %v356_v31 }
 0x1f9   : > { %787 = vpow2.f32 %v365_v32 }
 0x201   : > { %v786_v33 = vpop.eup %785 }
 0x202   : > { %489 = vperm.xlu1 %783, %v786_v33   ;;  %v368_v43 = vmul.f32 %v786_v33, %v367_v40 }
 0x203   : > { %v788_v34 = vpop.eup %787 }
 0x204   : > { %v370_v35 = vsel %vm369_vm5, %v788_v34, 0.0  ;;  %380 = vxpose.xlu0.b32.start.end [1/1] (short) (narrow) %v788_v34, 8 }
 0x205   : > { %v371_v36 = vrot.slane %v370_v35, 4 }
 0x207   : > { %v372_v37 = vadd.f32 %v371_v36, %v370_v35 }
 0x209   : > { %v373_v38 = vrot.slane %v372_v37, 2 }
 0x20b   : > { %v374_v39 = vadd.f32 %v373_v38, %v372_v37 }
 0x20d   : > { %v375_v41 = vrot.slane %v374_v39, 1 }
 0x20f   : > { %v376_v42 = vadd.f32 %v375_v41, %v374_v39 }
 0x211   : > { %v377_v44 = vadd.f32 %v376_v42, %v368_v43 }
 0x213   : > { %379 = vst.msk [vmem:[#allocation3] sm:$0x1] %vm378_vm4, %v377_v44 }
 0x21a   : > { %v505_v53 = vld [vmem:[#allocation3] sm:$0x1] (!%p637_p6) }
 0x21b   : > { %790 = vrcp.f32 (!%p637_p6), %v505_v53 }
 0x225   : > { %v791_v55 = vpop.eup (!%p637_p6), %790 }
 0x22d   : > { %784 = vset.pattern.permute.xlu0 %v987_v15 }
 0x22e   : > { %789 = vset.pattern.permute.xlu0 (!%p637_p6), %v988_v54 }
 0x22f   : > { %510 = vperm.xlu0 (!%p637_p6), %789, %v791_v55  }
 0x281   : > { %v490_v46 = vpop.permute.xlu1 %489 }
 0x282   : > { %v495_v47 = vrot.slane %v490_v46, %v361_v25 }
 0x284   : > { %v396_v45 = vpop.trf.xlu0  ;;  %v496_v49 = vmul.f32 %v495_v47, %v486_v48 }
 0x285   : > { %656 = vmatmul.mubr.msk.f32.vlgmr.msra.gmra.mrb[0].mxu1 %vm412_vm6, %v396_v45 }
 0x2ae   : > { %v511_v57 = vpop.permute.xlu0 (!%p637_p6), %510 }
 0x2af   : > { %v516_v58 = vrot.slane (!%p637_p6), %v511_v57, %v361_v25 }
 0x355   : > { %504 = sbr.rel (%p637_p6) target bundleno = 870 (0x366), region = 52 }
 0x358   : > { %v482_v50 = vpop.f32.mrb[0].mxu1 }
 0x359   : > { %v497_v51 = vadd.f32 %v496_v49, %v482_v50  ;;  %v657_v52 = vpop.f32.mrb[1].mxu1 }
 0x35b   : > { %499 = vst.msk [vmem:[#allocation4] sm:$0x1] %vm498_vm7, %v497_v51 }
 0x362   : > { %v507_v56 = vld [vmem:[#allocation4] sm:$0x1] }
 0x363   : > { %v517_v59 = vmul.f32 %v516_v58, %v507_v56 }
 0x365   : > { %518 = vst.msk [vmem:[%s1207_s4] sm:$0x1] %vm498_vm7, %v517_v59 }
 0x366 PF: > { %s1324_s30 = sld [smem:[#allocation15_spill]]  ;;  %s1325_s9 = sld [smem:[#allocation16_spill]] }
 0x367   : > { %s1326_s27 = sld [smem:[#allocation22_spill]]  ;;  %s532_s10 = sshll.u32 %s1207_s4, 4  ;;  %s533_s10 = int_to_ptr.vmem [resolvable:$true] %s532_s10 }
 0x368   : > { %s520_s11 = scalar_lea.sflag [#allocation7], %s241_s2  ;;  %s850_s12 = scalar_lea.vmem %s533_s10, 16 }
 0x369   : > { %p851_p10 = scmp.ne.s32.totalorder %s533_s10, %s850_s12  ;;  %s989_s5 = smov [#allocation10]  }
 0x36a   : > { %s854_s3 = sshll.u32 %s989_s5, 4  ;;  %s855_s3 = int_to_ptr.vmem [resolvable:$false] %s854_s3 }
 0x36b   : > { %s856_s28 = scalar_lea.vmem %s855_s3, 32  ;;  %p857_p2 = scmp.lt.s32.totalorder %s533_s10, %s855_s3 }
 0x36c   : > { %s638_s21 = sshll.u32 %s1324_s30, 4  ;;  %p1327_p11 = scmp.ne.s32.totalorder %s1325_s9, 0 }
 0x36d   : > { %s1226_s7 = scalar_lea.hbm %s1326_s27, %s638_s21  ;;  %p858_p5 = scmp.lt.s32.totalorder %s856_s28, %s850_s12 }
 0x36e   : > { %p852_p13 = pnand %p851_p10, %p1327_p11 }
 0x36f   : > { %p859_p8 = por %p858_p5, %p857_p2 }
 0x370   : > { %p853_p0 = pneg %p852_p13 }
 0x372   : > { %p860_p12 = pnand %p859_p8, %p853_p0 }
 0x374   : > { %863 = shalt.err (!%p860_p12)
}
 0x375   : > { %s864_s2 = scalar_lea.hbm %s1226_s7, 16  ;;  %s868_s6 = scalar_lea.hbm %s1326_s27, 32 }
 0x376   : > { %p865_p1 = scmp.ne.s32.totalorder %s1226_s7, %s864_s2  ;;  %p869_p4 = scmp.lt.u32.totalorder %s1226_s7, %s1326_s27 }
 0x377   : > { %p870_p3 = scmp.lt.u32.totalorder %s868_s6, %s864_s2  ;;  %p872_p10 = scmp.lt.u32.totalorder %s864_s2, %s1226_s7 }
 0x378   : > { %p866_p9 = pnand %p865_p1, %p1327_p11 }
 0x379   : > { %p871_p6 = por %p870_p3, %p869_p4 }
 0x37a   : > { %p867_p7 = pneg %p866_p9 }
 0x37b   : > { %p873_p13 = por %p872_p10, %p871_p6 }
 0x37d   : > { %p874_p0 = pnand %p873_p13, %p867_p7 }
 0x37f   : > { %877 = shalt.err (!%p874_p0)
}
 0x380   : > { %667 = dma.vmem_to_hbm [thread:$0]  (%p1327_p11), %s533_s10, 16, %s1226_s7, %s520_s11  }
 0x381 PF: > { %s1328_s22 = sld [smem:[#allocation14_spill]]  ;;  %s1329_s30 = sld [smem:[#allocation17_spill]] }
 0x382   : > { %p684_p2 = scmp.ge.s32.totalorder %s976_s25, 2 }
 0x387   : > { %s544_s21 = sand.u32 1, %s1328_s22   ;;  %p1330_p5 = scmp.ne.s32.totalorder %s1329_s30, 0 }
 0x388   : > { %s545_s26 = scalar_lea.sflag [#allocation7], %s544_s21 }
 0x389   : > { %p678_p8 = pnand %p684_p2, %p1330_p5 }
 0x38b   : > { %931 = dma.done.wait (!%p678_p8), %s545_s26, 16  }
 0x38c   : > { %933 = vsyncadd (!%p678_p8), %s545_s26, 4294967280  ;;  %s21_s25 = sadd.s32 1, %s976_s25   ;;  %s1331_s9 = sld [smem:[#allocation18_spill]] }
 0x38d   : > { %p18_p12 = scmp.ge.s32.totalorder %s21_s25, 6   ;;  %s1332_s15 = smov %s940_s16 }
 0x38e   : > { %s1333_s16 = smov %s944_s17  ;;  %s1334_s17 = smov %s1147_s1 }
 0x38f   : > { %s1335_s18 = smov %s952_s19  ;;  %s1336_s19 = smov %s956_s20 }
 0x390   : > { %s1337_s20 = smov %s1150_s13  ;;  %s1338_s21 = smov %s968_s23 }
 0x391   : > { %s1339_s22 = smov %s972_s24  ;;  %s1341_s24 = smov %s1347_s14 }
 0x392   : > { %s1340_s23 = smov %s1331_s9  ;;  %20 = sbr.rel (!%p18_p12) target bundleno = 15 (0xf), region = 93 }
 0x399   :  { %549 = vsyncpa [#allocation6], 1 }
 0x39a   :  { %551 = vsyncpa [#allocation6 + $0x1], 1 }
 0x39b   :  { %552 = vsyncpa [#allocation9], 1 }
 0x39c   :  { %553 = vsyncpa [#allocation7], 1 }
 0x39d   :  { %555 = vsyncpa [#allocation7 + $0x1], 1 }

</bundles_post_ra>
